<compile_context>
chip_gen: v7x
topology: tpu7x:2x2x1
jax: 0.10.0
libtpu: 0.0.40
codegen_flags: <defaults>
</compile_context>

<pallas_src>
import functools

import jax
import jax.numpy as jnp
from jax.experimental import pallas as pl
from jax.experimental.pallas import tpu as pltpu


def _round_up(x, m):
    return ((x + m - 1) // m) * m


def _choose_tn(Bp, Dp, Lp, budget_bytes=12 << 20):
    """Largest lane-aligned decoder column tile that (a) divides Dp and
    (b) keeps the fused kernel's double-buffered VMEM footprint under
    `budget_bytes` (conservative for v7x's 32 MiB scoped default)."""
    # Grid-invariant blocks: x (bf16), fused enc weight (bf16), enc bias (f32),
    # eps (f32), mu/logvar/z outputs (f32).
    resident = (Bp * Dp * 2 + Dp * (2 * Lp) * 2 + (2 * Lp) * 4
                + Bp * Lp * 4 + 3 * Bp * Lp * 4)
    # Per-column-tile blocks (double buffered): w_dec (bf16) + b_dec (f32)
    # + x_hat tile (f32).
    per_col = 2 * (Lp * 2 + 4 + Bp * 4)
    avail = budget_bytes - 2 * resident
    if avail < per_col * 128:
        # TODO(synk): for very large D the resident x / w_enc blocks no longer
        # fit VMEM; a K-tiled (reduction-grid) two-stage variant is needed.
        raise NotImplementedError("problem too large for the fused-VMEM VAE kernel")
    tn_max = min(Dp, max(128, (avail // per_col) // 128 * 128))
    tn = 128
    for cand in range(128, tn_max + 1, 128):
        if Dp % cand == 0:
            tn = cand
    return tn


# --------------------------------------------------------------------------
# Fused kernel: encoder matmul + reparameterize + decoder column tile.
# Grid: (Dp // tn,) over decoder output columns.
# --------------------------------------------------------------------------
def _vae_fused_kernel(x_ref, wenc_ref, benc_ref, eps_ref, wdec_ref, bdec_ref,
                      mu_ref, lv_ref, z_ref, xhat_ref):
    # Encoder (fused mu ++ logvar weight) + reparameterization.  x / w_enc /
    # eps are grid-invariant VMEM residents (DMA'd once), so recomputing this
    # tiny [Bp, Dp] x [Dp, 2Lp] matmul per column tile costs no extra HBM
    # traffic and negligible MXU time, and keeps every grid step independent.
    # TODO(synk): if the column grid is ever marked "parallel" for v7x 2-TC
    # sharding, the grid-invariant mu/lv/z outputs must be revisited.
    enc = (jnp.dot(x_ref[...], wenc_ref[...],
                   preferred_element_type=jnp.float32) + benc_ref[...])
    lp = mu_ref.shape[-1]
    mu = enc[:, :lp]
    logvar = enc[:, lp:]
    z = mu + eps_ref[...] * jnp.exp(0.5 * logvar)     # f32 epilogue (v5e-safe)
    mu_ref[...] = mu
    lv_ref[...] = logvar
    z_ref[...] = z
    # Decoder column tile: bf16 MXU feed, f32 accumulate.
    xhat_ref[...] = (jnp.dot(z.astype(jnp.bfloat16), wdec_ref[...],
                             preferred_element_type=jnp.float32)
                     + bdec_ref[...])


def pack_vae_params(params, D, L):
    """One-time padding + bf16 cast of the VAE weights.

    Hoisted out of the per-forward hot path: the kernel reads each weight
    exactly once, so repacking per call would multiply HBM weight traffic.
    """
    bf16, f32 = jnp.bfloat16, jnp.float32
    Lp = _round_up(L, 128)
    Dp = _round_up(D, 128)
    pad_d, pad_l = Dp - D, Lp - L
    w_mu = jnp.pad(params["w_mu"].astype(bf16), ((0, pad_d), (0, pad_l)))
    w_lv = jnp.pad(params["w_lv"].astype(bf16), ((0, pad_d), (0, pad_l)))
    b_mu = jnp.pad(params["b_mu"].astype(f32), ((0, 0), (0, pad_l)))
    b_lv = jnp.pad(params["b_lv"].astype(f32), ((0, 0), (0, pad_l)))
    return {
        "w_enc": jnp.concatenate([w_mu, w_lv], axis=1),        # [Dp, 2*Lp] bf16
        "b_enc": jnp.concatenate([b_mu, b_lv], axis=1),        # [1, 2*Lp]  f32
        "w_dec": jnp.pad(params["w_dec"].astype(bf16),
                         ((0, pad_l), (0, pad_d))),             # [Lp, Dp]  bf16
        "b_dec": jnp.pad(params["b_dec"].astype(f32),
                         ((0, 0), (0, pad_d))),                 # [1, Dp]   f32
    }


@functools.partial(jax.jit, static_argnames=("L",))
def base_vae_forward(x_nchw, packed, eps, *, L):
    """Runs the BaseVAE forward.  Returns (x_hat, z, mu, logvar)."""
    B, C, H, W = x_nchw.shape
    D = C * H * W
    f32, bf16 = jnp.float32, jnp.bfloat16

    Bp = _round_up(B, 16)            # bf16 packs 2 rows / sublane
    Lp = _round_up(L, 128)           # lane-dense latent
    Dp = _round_up(D, 128)
    tn = _choose_tn(Bp, Dp, Lp)      # VMEM-budgeted decoder column tile
    n_j = Dp // tn

    assert packed["w_enc"].shape == (Dp, 2 * Lp)
    assert packed["w_dec"].shape == (Lp, Dp)

    # Per-call activation packing (bf16 cast before pad; weights are pre-packed).
    x_p = jnp.pad(x_nchw.reshape(B, D).astype(bf16), ((0, Bp - B), (0, Dp - D)))
    eps_p = jnp.pad(eps.astype(f32), ((0, Bp - B), (0, Lp - L)))

    mu_p, lv_p, z_p, xhat_p = pl.pallas_call(
        _vae_fused_kernel,
        out_shape=(jax.ShapeDtypeStruct((Bp, Lp), f32),    # mu
                   jax.ShapeDtypeStruct((Bp, Lp), f32),    # logvar
                   jax.ShapeDtypeStruct((Bp, Lp), f32),    # z
                   jax.ShapeDtypeStruct((Bp, Dp), f32)),   # x_hat
        grid=(n_j,),
        in_specs=[
            pl.BlockSpec((Bp, Dp), lambda j: (0, 0)),        # x (VMEM resident)
            pl.BlockSpec((Dp, 2 * Lp), lambda j: (0, 0)),    # fused enc weight
            pl.BlockSpec((1, 2 * Lp), lambda j: (0, 0)),     # fused enc bias
            pl.BlockSpec((Bp, Lp), lambda j: (0, 0)),        # eps
            pl.BlockSpec((Lp, tn), lambda j: (0, j)),        # decoder weight tile
            pl.BlockSpec((1, tn), lambda j: (0, j)),         # decoder bias tile
        ],
        out_specs=[
            pl.BlockSpec((Bp, Lp), lambda j: (0, 0)),        # mu
            pl.BlockSpec((Bp, Lp), lambda j: (0, 0)),        # logvar
            pl.BlockSpec((Bp, Lp), lambda j: (0, 0)),        # z
            pl.BlockSpec((Bp, tn), lambda j: (0, j)),        # x_hat tile
        ],
        compiler_params=pltpu.CompilerParams(
            dimension_semantics=("arbitrary",)),
    )(x_p, packed["w_enc"], packed["b_enc"], eps_p,
      packed["w_dec"], packed["b_dec"])

    mu = mu_p[:B, :L]
    logvar = lv_p[:B, :L]
    z = z_p[:B, :L]
    x_hat = xhat_p[:B, :D].reshape(B, C, H, W)
    return x_hat, z, mu, logvar


def make_params(key, D, L):
    """Deterministic synthetic parameters for the linear encoder/decoder."""
    k1, k2, k3 = jax.random.split(key, 3)
    scale_enc = 1.0 / jnp.sqrt(jnp.float32(D))
    scale_dec = 1.0 / jnp.sqrt(jnp.float32(L))
    return {
        "w_mu":  jax.random.normal(k1, (D, L), jnp.float32) * scale_enc,
        "b_mu":  jnp.zeros((1, L), jnp.float32),
        "w_lv":  jax.random.normal(k2, (D, L), jnp.float32) * scale_enc,
        "b_lv":  jnp.zeros((1, L), jnp.float32),
        "w_dec": jax.random.normal(k3, (L, D), jnp.float32) * scale_dec,
        "b_dec": jnp.zeros((1, D), jnp.float32),
    }


if __name__ == "__main__":
    B, C, H, W = 2, 4, 16, 16
    D = C * H * W          # 1024
    L = 32                 # latent size

    key = jax.random.PRNGKey(0)
    kx, kp, ke = jax.random.split(key, 3)

    x = jax.random.normal(kx, (B, C, H, W), jnp.float32)
    params = make_params(kp, D, L)
    eps = jax.random.normal(ke, (B, L), jnp.float32)   # eps = torch.randn_like(std)

    packed = pack_vae_params(params, D, L)             # one-time weight packing
    jax.block_until_ready(packed)

    x_hat, z, mu, logvar = base_vae_forward(x, packed, eps, L=L)
    jax.block_until_ready((x_hat, z, mu, logvar))

    # sanity vs. pure-JAX reference using the same bf16 weight quantization
    x2d_b = x.reshape(B, D).astype(jnp.bfloat16)
    wmu_b = params["w_mu"].astype(jnp.bfloat16)
    wlv_b = params["w_lv"].astype(jnp.bfloat16)
    wdec_b = params["w_dec"].astype(jnp.bfloat16)
    mu_ref = jnp.dot(x2d_b, wmu_b, preferred_element_type=jnp.float32) + params["b_mu"]
    lv_ref = jnp.dot(x2d_b, wlv_b, preferred_element_type=jnp.float32) + params["b_lv"]
    z_ref = mu_ref + eps * jnp.exp(0.5 * lv_ref)
    xhat_ref = (jnp.dot(z_ref.astype(jnp.bfloat16), wdec_b,
                        preferred_element_type=jnp.float32)
                + params["b_dec"]).reshape(B, C, H, W)

    assert jnp.allclose(mu, mu_ref, atol=1e-2, rtol=1e-2)
    assert jnp.allclose(logvar, lv_ref, atol=1e-2, rtol=1e-2)
    assert jnp.allclose(z, z_ref, atol=1e-2, rtol=1e-2)
    assert jnp.allclose(x_hat, xhat_ref, atol=1e-2, rtol=1e-2)

    print("KERNEL_OK")
</pallas_src>

<mosaic_0001>
module attributes {stable_mosaic.version = 11 : i64} {
  func.func @_vae_fused_kernel(%arg0: i32, %arg1: memref<16x1024xbf16, #tpu.memory_space<vmem>>, %arg2: memref<1024x256xbf16, #tpu.memory_space<vmem>>, %arg3: memref<1x256xf32, #tpu.memory_space<vmem>>, %arg4: memref<16x128xf32, #tpu.memory_space<vmem>>, %arg5: memref<128x1024xbf16, #tpu.memory_space<vmem>>, %arg6: memref<1x1024xf32, #tpu.memory_space<vmem>>, %arg7: memref<16x128xf32, #tpu.memory_space<vmem>>, %arg8: memref<16x128xf32, #tpu.memory_space<vmem>>, %arg9: memref<16x128xf32, #tpu.memory_space<vmem>>, %arg10: memref<16x1024xf32, #tpu.memory_space<vmem>>) attributes {dimension_semantics = [#tpu.dimension_semantics<arbitrary>], iteration_bounds = array<i64: 1>, scalar_prefetch = 0 : i64, scratch_operands = 0 : i64, tpu.core_type = #tpu.core_type<tc>, window_params = [{pipeline_mode = #tpu.pipeline_mode<synchronous>, transform_indices = @transform_0, window_bounds = array<i64: 16, 1024>}, {pipeline_mode = #tpu.pipeline_mode<synchronous>, transform_indices = @transform_1, window_bounds = array<i64: 1024, 256>}, {pipeline_mode = #tpu.pipeline_mode<synchronous>, transform_indices = @transform_2, window_bounds = array<i64: 1, 256>}, {pipeline_mode = #tpu.pipeline_mode<synchronous>, transform_indices = @transform_3, window_bounds = array<i64: 16, 128>}, {transform_indices = @transform_4, window_bounds = array<i64: 128, 1024>}, {transform_indices = @transform_5, window_bounds = array<i64: 1, 1024>}, {pipeline_mode = #tpu.pipeline_mode<synchronous>, transform_indices = @transform_6, window_bounds = array<i64: 16, 128>}, {pipeline_mode = #tpu.pipeline_mode<synchronous>, transform_indices = @transform_7, window_bounds = array<i64: 16, 128>}, {pipeline_mode = #tpu.pipeline_mode<synchronous>, transform_indices = @transform_8, window_bounds = array<i64: 16, 128>}, {transform_indices = @transform_9, window_bounds = array<i64: 16, 1024>}]} {
    %c0 = arith.constant 0 : index
    %c0_0 = arith.constant 0 : index
    %0 = vector.load %arg1[%c0, %c0_0] : memref<16x1024xbf16, #tpu.memory_space<vmem>>, vector<16x1024xbf16>
    %c0_1 = arith.constant 0 : index
    %c0_2 = arith.constant 0 : index
    %1 = vector.load %arg2[%c0_1, %c0_2] : memref<1024x256xbf16, #tpu.memory_space<vmem>>, vector<1024x256xbf16>
    %cst = arith.constant dense<0.000000e+00> : vector<16x256xf32>
    %2 = tpu.matmul %0, %1, %cst {dimension_numbers = #tpu.dot_dimension_numbers<[1], [0], [0], [1], [0, 0, 1, 1], [], []>} : vector<16x1024xbf16>, vector<1024x256xbf16>, vector<16x256xf32> -> vector<16x256xf32>
    %c0_3 = arith.constant 0 : index
    %c0_4 = arith.constant 0 : index
    %3 = vector.load %arg3[%c0_3, %c0_4] : memref<1x256xf32, #tpu.memory_space<vmem>>, vector<1x256xf32>
    %4 = vector.broadcast %3 : vector<1x256xf32> to vector<16x256xf32>
    %5 = arith.addf %2, %4 : vector<16x256xf32>
    %6 = vector.extract_strided_slice %5 {offsets = [0, 0], sizes = [16, 128], strides = [1, 1]} : vector<16x256xf32> to vector<16x128xf32>
    %7 = vector.extract_strided_slice %5 {offsets = [0, 128], sizes = [16, 128], strides = [1, 1]} : vector<16x256xf32> to vector<16x128xf32>
    %c0_5 = arith.constant 0 : index
    %c0_6 = arith.constant 0 : index
    %8 = vector.load %arg4[%c0_5, %c0_6] : memref<16x128xf32, #tpu.memory_space<vmem>>, vector<16x128xf32>
    %cst_7 = arith.constant 5.000000e-01 : f32
    %9 = vector.broadcast %cst_7 : f32 to vector<16x128xf32>
    %10 = arith.mulf %9, %7 : vector<16x128xf32>
    %11 = math.exp %10 : vector<16x128xf32>
    %12 = arith.mulf %8, %11 : vector<16x128xf32>
    %13 = arith.addf %6, %12 : vector<16x128xf32>
    %c0_8 = arith.constant 0 : index
    %c0_9 = arith.constant 0 : index
    %14 = vector.load %arg7[%c0_8, %c0_9] : memref<16x128xf32, #tpu.memory_space<vmem>>, vector<16x128xf32>
    tpu.vector_store %arg7[%c0_8, %c0_9], %6 {strides = array<i32>} : memref<16x128xf32, #tpu.memory_space<vmem>>, vector<16x128xf32>,
    %c0_10 = arith.constant 0 : index
    %c0_11 = arith.constant 0 : index
    %15 = vector.load %arg8[%c0_10, %c0_11] : memref<16x128xf32, #tpu.memory_space<vmem>>, vector<16x128xf32>
    tpu.vector_store %arg8[%c0_10, %c0_11], %7 {strides = array<i32>} : memref<16x128xf32, #tpu.memory_space<vmem>>, vector<16x128xf32>,
    %c0_12 = arith.constant 0 : index
    %c0_13 = arith.constant 0 : index
    %16 = vector.load %arg9[%c0_12, %c0_13] : memref<16x128xf32, #tpu.memory_space<vmem>>, vector<16x128xf32>
    tpu.vector_store %arg9[%c0_12, %c0_13], %13 {strides = array<i32>} : memref<16x128xf32, #tpu.memory_space<vmem>>, vector<16x128xf32>,
    %17 = arith.truncf %13 : vector<16x128xf32> to vector<16x128xbf16>
    %c0_14 = arith.constant 0 : index
    %c0_15 = arith.constant 0 : index
    %18 = vector.load %arg5[%c0_14, %c0_15] : memref<128x1024xbf16, #tpu.memory_space<vmem>>, vector<128x1024xbf16>
    %cst_16 = arith.constant dense<0.000000e+00> : vector<16x1024xf32>
    %19 = tpu.matmul %17, %18, %cst_16 {dimension_numbers = #tpu.dot_dimension_numbers<[1], [0], [0], [1], [0, 0, 1, 1], [], []>} : vector<16x128xbf16>, vector<128x1024xbf16>, vector<16x1024xf32> -> vector<16x1024xf32>
    %c0_17 = arith.constant 0 : index
    %c0_18 = arith.constant 0 : index
    %20 = vector.load %arg6[%c0_17, %c0_18] : memref<1x1024xf32, #tpu.memory_space<vmem>>, vector<1x1024xf32>
    %21 = vector.broadcast %20 : vector<1x1024xf32> to vector<16x1024xf32>
    %22 = arith.addf %19, %21 : vector<16x1024xf32>
    %c0_19 = arith.constant 0 : index
    %c0_20 = arith.constant 0 : index
    %23 = vector.load %arg10[%c0_19, %c0_20] : memref<16x1024xf32, #tpu.memory_space<vmem>>, vector<16x1024xf32>
    tpu.vector_store %arg10[%c0_19, %c0_20], %22 {strides = array<i32>} : memref<16x1024xf32, #tpu.memory_space<vmem>>, vector<16x1024xf32>,
    return
  }
  func.func @transform_0(%arg0: i32) -> (i32, i32) {
    %c0_i32 = arith.constant 0 : i32
    %c0_i32_0 = arith.constant 0 : i32
    %c0_i32_1 = arith.constant 0 : i32
    return %c0_i32, %c0_i32_0 : i32, i32
  }
  func.func @transform_1(%arg0: i32) -> (i32, i32) {
    %c0_i32 = arith.constant 0 : i32
    %c0_i32_0 = arith.constant 0 : i32
    %c0_i32_1 = arith.constant 0 : i32
    return %c0_i32, %c0_i32_0 : i32, i32
  }
  func.func @transform_2(%arg0: i32) -> (i32, i32) {
    %c0_i32 = arith.constant 0 : i32
    %c0_i32_0 = arith.constant 0 : i32
    %c0_i32_1 = arith.constant 0 : i32
    return %c0_i32, %c0_i32_0 : i32, i32
  }
  func.func @transform_3(%arg0: i32) -> (i32, i32) {
    %c0_i32 = arith.constant 0 : i32
    %c0_i32_0 = arith.constant 0 : i32
    %c0_i32_1 = arith.constant 0 : i32
    return %c0_i32, %c0_i32_0 : i32, i32
  }
  func.func @transform_4(%arg0: i32) -> (i32, i32) {
    %c0_i32 = arith.constant 0 : i32
    %c0_i32_0 = arith.constant 0 : i32
    return %c0_i32, %arg0 : i32, i32
  }
  func.func @transform_5(%arg0: i32) -> (i32, i32) {
    %c0_i32 = arith.constant 0 : i32
    %c0_i32_0 = arith.constant 0 : i32
    return %c0_i32, %arg0 : i32, i32
  }
  func.func @transform_6(%arg0: i32) -> (i32, i32) {
    %c0_i32 = arith.constant 0 : i32
    %c0_i32_0 = arith.constant 0 : i32
    %c0_i32_1 = arith.constant 0 : i32
    return %c0_i32, %c0_i32_0 : i32, i32
  }
  func.func @transform_7(%arg0: i32) -> (i32, i32) {
    %c0_i32 = arith.constant 0 : i32
    %c0_i32_0 = arith.constant 0 : i32
    %c0_i32_1 = arith.constant 0 : i32
    return %c0_i32, %c0_i32_0 : i32, i32
  }
  func.func @transform_8(%arg0: i32) -> (i32, i32) {
    %c0_i32 = arith.constant 0 : i32
    %c0_i32_0 = arith.constant 0 : i32
    %c0_i32_1 = arith.constant 0 : i32
    return %c0_i32, %c0_i32_0 : i32, i32
  }
  func.func @transform_9(%arg0: i32) -> (i32, i32) {
    %c0_i32 = arith.constant 0 : i32
    %c0_i32_0 = arith.constant 0 : i32
    return %c0_i32, %arg0 : i32, i32
  }
}

</mosaic_0001>

<bundles_post_ra>
// kernel: base_vae_forward.1
= control target key start
LH: loop header
LB: loop body
LE: loop exit
PB: predicated region body
PF: predicated region fallthrough
CT: control target
= control target key end

     0   :  { %15 = vsyncpa [#allocation3], 0  ;;  %s2417_s0 = inlined_call_operand.vmem [shape: bf16[16,1024], index: 0, kind: input, shape index: {}]   ;;  %s2418_s1 = inlined_call_operand.hbm [shape: bf16[1024,256], index: 1, kind: input, shape index: {}]   ;;  %s2419_s2 = inlined_call_operand.vmem [shape: f32[1,256], index: 2, kind: input, shape index: {}]   ;;  %s2420_s3 = inlined_call_operand.vmem [shape: f32[16,128], index: 3, kind: input, shape index: {}]   ;;  %s2421_s4 = inlined_call_operand.hbm [shape: bf16[128,1024], index: 4, kind: input, shape index: {}]   ;;  %s2422_s5 = inlined_call_operand.vmem [shape: f32[1,1024], index: 5, kind: input, shape index: {}]   ;;  %s2423_s6 = inlined_call_operand.vmem [shape: f32[16,128], index: 6, kind: output, shape index: {0}]   ;;  %s2424_s7 = inlined_call_operand.vmem [shape: f32[16,128], index: 7, kind: output, shape index: {1}]   ;;  %s2425_s8 = inlined_call_operand.vmem [shape: f32[16,128], index: 8, kind: output, shape index: {2}]   ;;  %s2426_s9 = inlined_call_operand.vmem [shape: f32[16,1024], index: 9, kind: output, shape index: {3}]  }
   0x1   :  { %16 = vsyncpa [#allocation5], 0  ;;  %s2174_s30 = smov [#allocation2]   ;;  %s2126_s13 = scalar_lea.hbm %s2418_s1, 16384 }
   0x2   :  { %s24_s10 = sshll.u32 %s2174_s30, 4  ;;  %p2127_p0 = scmp.ne.s32.totalorder %s2418_s1, %s2126_s13  ;;  %s25_s10 = int_to_ptr.vmem [resolvable:$true] %s24_s10 }
   0x3   :  { %p2130_p1 = scmp.lt.u32.totalorder %s2126_s13, %s2418_s1 }
   0x5   :  { %p2132_p2 = pnand %p2130_p1, %p2127_p0 }
   0x7   :  { %2135 = shalt.err (!%p2132_p2)
}
   0x8   :  { %s2136_s18 = scalar_lea.vmem %s25_s10, 16384  ;;  %p2141_p4 = scmp.lt.s32.totalorder %s25_s10, %s25_s10 }
   0x9   :  { %p2137_p3 = scmp.ne.s32.totalorder %s25_s10, %s2136_s18  ;;  %p2142_p5 = scmp.lt.s32.totalorder %s2136_s18, %s2136_s18 }
   0xb   :  { %p2143_p6 = por %p2142_p5, %p2141_p4 }
   0xd   :  { %p2144_p7 = pnand %p2143_p6, %p2137_p3 }
   0xf   :  { %2147 = shalt.err (!%p2144_p7)
}
  0x10   :  { %s2175_s19 = smov 128   ;;  %s2176_s20 = smov 8  }
  0x11   :  { %30 = dma.hbm_to_vmem [thread:$0]  %s2418_s1, 16384, %s25_s10, [#allocation3], %s2175_s19, %s2175_s19, %s2176_s20  }
  0x12   :  { %s2177_s23 = smov [#allocation4]   ;;  %s2148_s27 = scalar_lea.hbm %s2421_s4, 8192 }
  0x13   :  { %s40_s24 = sshll.u32 %s2177_s23, 4  ;;  %p2149_p8 = scmp.ne.s32.totalorder %s2421_s4, %s2148_s27  ;;  %s41_s24 = int_to_ptr.vmem [resolvable:$true] %s40_s24 }
  0x14   :  { %p2152_p9 = scmp.lt.u32.totalorder %s2148_s27, %s2421_s4 }
  0x16   :  { %p2154_p10 = pnand %p2152_p9, %p2149_p8 }
  0x18   :  { %2157 = shalt.err (!%p2154_p10)
}
  0x19   :  { %s2158_s12 = scalar_lea.vmem %s41_s24, 8192  ;;  %p2163_p12 = scmp.lt.s32.totalorder %s41_s24, %s41_s24 }
  0x1a   :  { %p2159_p11 = scmp.ne.s32.totalorder %s41_s24, %s2158_s12  ;;  %p2164_p13 = scmp.lt.s32.totalorder %s2158_s12, %s2158_s12 }
  0x1c   :  { %p2165_p0 = por %p2164_p13, %p2163_p12 }
  0x1e   :  { %p2166_p1 = pnand %p2165_p0, %p2159_p11 }
  0x20   :  { %2169 = shalt.err (!%p2166_p1)
}
  0x21   :  { %s2178_s1 = smov 512   ;;  %s2179_s10 = smov 32  }
  0x22   :  { %46 = dma.hbm_to_vmem [thread:$0]  %s2421_s4, 8192, %s41_s24, [#allocation5], %s2178_s1, %s2178_s1, %s2179_s10  }
  0x23   :  { %2170 = dma.done.wait [#allocation3], 16384  }
  0x24   :  { %2171 = vsyncadd [#allocation3], 4294950912 }
  0x25   :  { %2172 = dma.done.wait [#allocation5], 8192  }
  0x26   :  { %2173 = vsyncadd [#allocation5], 4294959104  ;;  %v1930_v0 = vld [vmem:[#allocation2 + $0x104] ss:$8 sps:$4 sm:$0xff]   ;;  %v1932_v1 = vld [vmem:[#allocation2 + $0x100] ss:$8 sps:$4 sm:$0xff]  }
  0x27   :  { %927 = vmatprep.subr.bf16.mxu0 %v1930_v0  ;;  %v1933_v2 = vld [vmem:[#allocation2 + $0x114] ss:$8 sps:$4 sm:$0xff]   ;;  %v1935_v3 = vld [vmem:[#allocation2 + $0x110] ss:$8 sps:$4 sm:$0xff]   ;;  %v1936_v4 = vld [vmem:[#allocation2 + $0x124] ss:$8 sps:$4 sm:$0xff]  }
  0x28   :  { %928 = vmatpush1.bf16.msra.mxu0 %v1932_v1  ;;  %v1938_v5 = vld [vmem:[#allocation2 + $0x120] ss:$8 sps:$4 sm:$0xff]   ;;  %v1939_v6 = vld [vmem:[#allocation2 + $0x134] ss:$8 sps:$4 sm:$0xff]   ;;  %v1941_v7 = vld [vmem:[#allocation2 + $0x130] ss:$8 sps:$4 sm:$0xff]  }
  0x29   :  { %929 = vmatprep.subr.bf16.mxu0 %v1933_v2  ;;  %v1942_v8 = vld [vmem:[#allocation2 + $0x144] ss:$8 sps:$4 sm:$0xff]   ;;  %v1944_v9 = vld [vmem:[#allocation2 + $0x140] ss:$8 sps:$4 sm:$0xff]   ;;  %v1945_v10 = vld [vmem:[#allocation2 + $0x154] ss:$8 sps:$4 sm:$0xff]  }
  0x2a   :  { %v1947_v11 = vld [vmem:[#allocation2 + $0x150] ss:$8 sps:$4 sm:$0xff]   ;;  %v1948_v12 = vld [vmem:[#allocation2 + $0x164] ss:$8 sps:$4 sm:$0xff]   ;;  %v1950_v16 = vld [vmem:[#allocation2 + $0x160] ss:$8 sps:$4 sm:$0xff]  }
  0x2b   :  { %v2258_v13 = vld [vmem:[%s2417_s0 + $0x8] sm:$0xff]  ;;  %v1951_v17 = vld [vmem:[#allocation2 + $0x174] ss:$8 sps:$4 sm:$0xff]   ;;  %v1953_v18 = vld [vmem:[#allocation2 + $0x170] ss:$8 sps:$4 sm:$0xff]  }
  0x2c   :  { %930 = vmatpush1.bf16.msra.mxu0 %v1935_v3  ;;  %v2263_v14 = vld [vmem:[%s2417_s0 + $0x28] sm:$0xff]  ;;  %v1957_v21 = vld [vmem:[#allocation2 + $0x194] ss:$8 sps:$4 sm:$0xff]   ;;  %v1959_v22 = vld [vmem:[#allocation2 + $0x190] ss:$8 sps:$4 sm:$0xff]  }
  0x2d   :  { %931 = vmatprep.subr.bf16.mxu0 %v1936_v4  ;;  %v1710_v15 = vcombine.high %v2258_v13, %v2263_v14  ;;  %v1954_v19 = vld [vmem:[#allocation2 + $0x184] ss:$8 sps:$4 sm:$0xff]   ;;  %v1956_v20 = vld [vmem:[#allocation2 + $0x180] ss:$8 sps:$4 sm:$0xff]   ;;  %v1963_v25 = vld [vmem:[#allocation2 + $0x1b4] ss:$8 sps:$4 sm:$0xff]   ;;  %v1709_v50 = vcombine.low %v2258_v13, %v2263_v14 }
  0x2e   :  { %v1960_v23 = vld [vmem:[#allocation2 + $0x1a4] ss:$8 sps:$4 sm:$0xff]   ;;  %v1962_v24 = vld [vmem:[#allocation2 + $0x1a0] ss:$8 sps:$4 sm:$0xff]   ;;  %v1965_v26 = vld [vmem:[#allocation2 + $0x1b0] ss:$8 sps:$4 sm:$0xff]  }
  0x2f   :  { %959 = vmatprep.mubr.bf16.mxu0 %v1710_v15  ;;  %v2023_v27 = vld [vmem:[#allocation2 + $0x4] ss:$8 sps:$4 sm:$0xff]   ;;  %v2025_v28 = vld [vmem:[#allocation2] ss:$8 sps:$4 sm:$0xff]   ;;  %v2029_v30 = vld [vmem:[#allocation2 + $0x14] ss:$8 sps:$4 sm:$0xff]  }
  0x30   :  { %932 = vmatpush1.bf16.msra.mxu0 %v1938_v5  ;;  %v1966_v29 = vld [vmem:[#allocation2 + $0x1c4] ss:$8 sps:$4 sm:$0xff]   ;;  %884 = vmatprep.subr.bf16.mxu1 %v2023_v27  ;;  %v2031_v31 = vld [vmem:[#allocation2 + $0x10] ss:$8 sps:$4 sm:$0xff]   ;;  %v1968_v32 = vld [vmem:[#allocation2 + $0x1c0] ss:$8 sps:$4 sm:$0xff]  }
  0x31   :  { %933 = vmatprep.subr.bf16.mxu0 %v1939_v6  ;;  %885 = vmatpush1.bf16.msra.mxu1 %v2025_v28  ;;  %v1969_v33 = vld [vmem:[#allocation2 + $0x1d4] ss:$8 sps:$4 sm:$0xff]   ;;  %v2035_v34 = vld [vmem:[#allocation2 + $0x24] ss:$8 sps:$4 sm:$0xff]   ;;  %v2037_v35 = vld [vmem:[#allocation2 + $0x20] ss:$8 sps:$4 sm:$0xff]  }
  0x32   :  { %886 = vmatprep.subr.bf16.mxu1 %v2029_v30  ;;  %v1971_v36 = vld [vmem:[#allocation2 + $0x1d0] ss:$8 sps:$4 sm:$0xff]   ;;  %v2041_v37 = vld [vmem:[#allocation2 + $0x34] ss:$8 sps:$4 sm:$0xff]   ;;  %v1972_v38 = vld [vmem:[#allocation2 + $0x1e4] ss:$8 sps:$4 sm:$0xff]  }
  0x33   :  { %v2043_v39 = vld [vmem:[#allocation2 + $0x30] ss:$8 sps:$4 sm:$0xff]   ;;  %v2047_v40 = vld [vmem:[#allocation2 + $0x44] ss:$8 sps:$4 sm:$0xff]   ;;  %v1974_v41 = vld [vmem:[#allocation2 + $0x1e0] ss:$8 sps:$4 sm:$0xff]  }
  0x34   :  { %934 = vmatpush1.bf16.msra.mxu0 %v1941_v7  ;;  %v1975_v42 = vld [vmem:[#allocation2 + $0x1f4] ss:$8 sps:$4 sm:$0xff]   ;;  %v2049_v43 = vld [vmem:[#allocation2 + $0x40] ss:$8 sps:$4 sm:$0xff]   ;;  %v1977_v44 = vld [vmem:[#allocation2 + $0x1f0] ss:$8 sps:$4 sm:$0xff]  }
  0x35   :  { %935 = vmatprep.subr.bf16.mxu0 %v1942_v8  ;;  %887 = vmatpush1.bf16.msra.mxu1 %v2031_v31  ;;  %v2053_v45 = vld [vmem:[#allocation2 + $0x54] ss:$8 sps:$4 sm:$0xff]   ;;  %v1980_v46 = vld [vmem:[#allocation2 + $0x204] ss:$8 sps:$4 sm:$0xff]   ;;  %v2055_v49 = vld [vmem:[#allocation2 + $0x50] ss:$8 sps:$4 sm:$0xff]  }
  0x36   :  { %888 = vmatprep.subr.bf16.mxu1 %v2035_v34  ;;  %v2270_v47 = vld [vmem:[%s2417_s0 + $0x10] sm:$0xff]  ;;  %v2059_v51 = vld [vmem:[#allocation2 + $0x64] ss:$8 sps:$4 sm:$0xff]   ;;  %v1978_v52 = vld [vmem:[#allocation2 + $0x200] ss:$8 sps:$4 sm:$0xff]  }
  0x37   :  { %v2275_v48 = vld [vmem:[%s2417_s0 + $0x30] sm:$0xff]  ;;  %v2061_v55 = vld [vmem:[#allocation2 + $0x60] ss:$8 sps:$4 sm:$0xff]   ;;  %v1986_v58 = vld [vmem:[#allocation2 + $0x224] ss:$8 sps:$4 sm:$0xff]  }
  0x38   :  { %936 = vmatpush1.bf16.msra.mxu0 %v1944_v9  ;;  %v1712_v53 = vcombine.high %v2270_v47, %v2275_v48  ;;  %v1983_v54 = vld [vmem:[#allocation2 + $0x214] ss:$8 sps:$4 sm:$0xff]   ;;  %v1981_v57 = vld [vmem:[#allocation2 + $0x210] ss:$8 sps:$4 sm:$0xff]   ;;  %v2071_v60 = vld [vmem:[#allocation2 + $0x84] ss:$8 sps:$4 sm:$0xff]  }
  0x39   :  { %937 = vmatprep.subr.bf16.mxu0 %v1945_v10  ;;  %889 = vmatpush1.bf16.msra.mxu1 %v2037_v35  ;;  %v2065_v56 = vld [vmem:[#allocation2 + $0x74] ss:$8 sps:$4 sm:$0xff]   ;;  %v2067_v59 = vld [vmem:[#allocation2 + $0x70] ss:$8 sps:$4 sm:$0xff]   ;;  %v1984_v61 = vld [vmem:[#allocation2 + $0x220] ss:$8 sps:$4 sm:$0xff]  }
  0x3a   :  { %890 = vmatprep.subr.bf16.mxu1 %v2041_v37  ;;  %v1989_v62 = vld [vmem:[#allocation2 + $0x234] ss:$8 sps:$4 sm:$0xff]   ;;  %v2073_v63 = vld [vmem:[#allocation2 + $0x80] ss:$8 sps:$4 sm:$0xff]   ;;  %v1987_v1 = vld [vmem:[#allocation2 + $0x230] ss:$8 sps:$4 sm:$0xff]  }
  0x3b   :  { %v2077_v0 = vld [vmem:[#allocation2 + $0x94] ss:$8 sps:$4 sm:$0xff]   ;;  %v1992_v2 = vld [vmem:[#allocation2 + $0x244] ss:$8 sps:$4 sm:$0xff]   ;;  %v2079_v3 = vld [vmem:[#allocation2 + $0x90] ss:$8 sps:$4 sm:$0xff]  }
  0x3c   :  { %938 = vmatpush1.bf16.msra.mxu0 %v1947_v11  ;;  %v2083_v4 = vld [vmem:[#allocation2 + $0xa4] ss:$8 sps:$4 sm:$0xff]   ;;  %v1990_v5 = vld [vmem:[#allocation2 + $0x240] ss:$8 sps:$4 sm:$0xff]   ;;  %v1995_v6 = vld [vmem:[#allocation2 + $0x254] ss:$8 sps:$4 sm:$0xff]  }
  0x3d   :  { %939 = vmatprep.subr.bf16.mxu0 %v1948_v12  ;;  %891 = vmatpush1.bf16.msra.mxu1 %v2043_v39  ;;  %v2085_v7 = vld [vmem:[#allocation2 + $0xa0] ss:$8 sps:$4 sm:$0xff]   ;;  %v2089_v8 = vld [vmem:[#allocation2 + $0xb4] ss:$8 sps:$4 sm:$0xff]   ;;  %v1993_v9 = vld [vmem:[#allocation2 + $0x250] ss:$8 sps:$4 sm:$0xff]  }
  0x3e   :  { %892 = vmatprep.subr.bf16.mxu1 %v2047_v40  ;;  %v1998_v10 = vld [vmem:[#allocation2 + $0x264] ss:$8 sps:$4 sm:$0xff]   ;;  %v2091_v11 = vld [vmem:[#allocation2 + $0xb0] ss:$8 sps:$4 sm:$0xff]   ;;  %v2113_v27 = vld [vmem:[#allocation2 + $0xf4] ss:$8 sps:$4 sm:$0xff]  }
  0x3f   :  { %v56_v12 = vld [vmem:[%s2417_s0] sm:$0xff]  ;;  %v2005_v28 = vld [vmem:[#allocation2 + $0x290] ss:$8 sps:$4 sm:$0xff]   ;;  %v2013_v35 = vld [vmem:[#allocation2 + $0x2b4] ss:$8 sps:$4 sm:$0xff]  }
  0x40   :  { %940 = vmatpush1.bf16.msra.mxu0 %v1950_v16  ;;  %v60_v13 = vld [vmem:[%s2417_s0 + $0x20] sm:$0xff] }
  0x41   :  { %941 = vmatprep.subr.bf16.mxu0 %v1951_v17  ;;  %893 = vmatpush1.bf16.msra.mxu1 %v2049_v43  ;;  %v2095_v14 = vld [vmem:[#allocation2 + $0xc4] ss:$8 sps:$4 sm:$0xff]   ;;  %v1708_v15 = vcombine.high %v56_v12, %v60_v13  ;;  %v1996_v16 = vld [vmem:[#allocation2 + $0x260] ss:$8 sps:$4 sm:$0xff]   ;;  %v2001_v17 = vld [vmem:[#allocation2 + $0x274] ss:$8 sps:$4 sm:$0xff]  }
  0x42   :  { %894 = vmatprep.subr.bf16.mxu1 %v2053_v45  ;;  %v1079_v30 = vld [vmem:[#allocation4 + $0x20] sm:$0xff]  ;;  %v2028_v45 = vld [vmem:[#allocation2 + $0x2f4] ss:$8 sps:$4 sm:$0xff]  }
  0x43   :  { %916 = vmatprep.mubr.bf16.mxu1 %v1708_v15  ;;  %v2010_v31 = vld [vmem:[#allocation2 + $0x2a4] ss:$8 sps:$4 sm:$0xff]   ;;  %v2008_v34 = vld [vmem:[#allocation2 + $0x2a0] ss:$8 sps:$4 sm:$0xff]  }
  0x44   :  { %942 = vmatpush1.bf16.msra.mxu0 %v1953_v18  ;;  %v2097_v18 = vld [vmem:[#allocation2 + $0xc0] ss:$8 sps:$4 sm:$0xff]   ;;  %v2016_v39 = vld [vmem:[#allocation2 + $0x2c4] ss:$8 sps:$4 sm:$0xff]  }
  0x45   :  { %943 = vmatprep.subr.bf16.mxu0 %v1954_v19  ;;  %895 = vmatpush1.bf16.msra.mxu1 %v2055_v49  ;;  %v2101_v19 = vld [vmem:[#allocation2 + $0xd4] ss:$8 sps:$4 sm:$0xff]   ;;  %v2014_v40 = vld [vmem:[#allocation2 + $0x2c0] ss:$8 sps:$4 sm:$0xff]   ;;  %v2022_v43 = vld [vmem:[#allocation2 + $0x2e4] ss:$8 sps:$4 sm:$0xff]  }
  0x46   :  { %896 = vmatprep.subr.bf16.mxu1 %v2059_v51  ;;  %v2034_v49 = vld [vmem:[#allocation2 + $0x304] ss:$8 sps:$4 sm:$0xff]   ;;  %v2295_v51 = vld [vmem:[%s2417_s0 + $0x38] sm:$0xff] }
  0x47   :  { %v2118_v15 = vld [vmem:[#allocation2 + $0x3e4] ss:$8 sps:$4 sm:$0xff]  }
  0x48   :  { %944 = vmatpush1.bf16.msra.mxu0 %v1956_v20  ;;  %v1999_v20 = vld [vmem:[#allocation2 + $0x270] ss:$8 sps:$4 sm:$0xff]  }
  0x49   :  { %945 = vmatprep.subr.bf16.mxu0 %v1957_v21  ;;  %897 = vmatpush1.bf16.msra.mxu1 %v2061_v55  ;;  %v2004_v21 = vld [vmem:[#allocation2 + $0x284] ss:$8 sps:$4 sm:$0xff]   ;;  %v2040_v55 = vld [vmem:[#allocation2 + $0x314] ss:$8 sps:$4 sm:$0xff]  }
  0x4a   :  { %898 = vmatprep.subr.bf16.mxu1 %v2065_v56  ;;  %v2038_v56 = vld [vmem:[#allocation2 + $0x310] ss:$8 sps:$4 sm:$0xff]  }
  0x4c   :  { %946 = vmatpush1.bf16.msra.mxu0 %v1959_v22  ;;  %v2103_v22 = vld [vmem:[#allocation2 + $0xd0] ss:$8 sps:$4 sm:$0xff]  }
  0x4d   :  { %947 = vmatprep.subr.bf16.mxu0 %v1960_v23  ;;  %899 = vmatpush1.bf16.msra.mxu1 %v2067_v59  ;;  %v2107_v23 = vld [vmem:[#allocation2 + $0xe4] ss:$8 sps:$4 sm:$0xff]   ;;  %v2052_v59 = vld [vmem:[#allocation2 + $0x334] ss:$8 sps:$4 sm:$0xff]  }
  0x4e   :  { %900 = vmatprep.subr.bf16.mxu1 %v2071_v60  ;;  %v2050_v60 = vld [vmem:[#allocation2 + $0x330] ss:$8 sps:$4 sm:$0xff]  }
  0x50   :  { %948 = vmatpush1.bf16.msra.mxu0 %v1962_v24  ;;  %v2002_v24 = vld [vmem:[#allocation2 + $0x280] ss:$8 sps:$4 sm:$0xff]  }
  0x51   :  { %949 = vmatprep.subr.bf16.mxu0 %v1963_v25  ;;  %901 = vmatpush1.bf16.msra.mxu1 %v2073_v63  ;;  %v2007_v25 = vld [vmem:[#allocation2 + $0x294] ss:$8 sps:$4 sm:$0xff]   ;;  %v2070_v63 = vld [vmem:[#allocation2 + $0x364] ss:$8 sps:$4 sm:$0xff]  }
  0x52   :  { %902 = vmatprep.subr.bf16.mxu1 %v2077_v0  ;;  %v2068_v0 = vld [vmem:[#allocation2 + $0x360] ss:$8 sps:$4 sm:$0xff]  }
  0x54   :  { %950 = vmatpush1.bf16.msra.mxu0 %v1965_v26  ;;  %v2109_v26 = vld [vmem:[#allocation2 + $0xe0] ss:$8 sps:$4 sm:$0xff]  }
  0x55   :  { %951 = vmatprep.subr.bf16.mxu0 %v1966_v29  ;;  %903 = vmatpush1.bf16.msra.mxu1 %v2079_v3  ;;  %v1075_v29 = vld [vmem:[#allocation4] sm:$0xff] }
  0x56   :  { %904 = vmatprep.subr.bf16.mxu1 %v2083_v4  ;;  %v1843_v37 = vcombine.low %v1075_v29, %v1079_v30  ;;  %v2082_v3 = vld [vmem:[#allocation2 + $0x384] ss:$8 sps:$4 sm:$0xff]   ;;  %v2080_v4 = vld [vmem:[#allocation2 + $0x380] ss:$8 sps:$4 sm:$0xff]  }
  0x58   :  { %952 = vmatpush1.bf16.msra.mxu0 %v1968_v32  ;;  %v2115_v32 = vld [vmem:[#allocation2 + $0xf0] ss:$8 sps:$4 sm:$0xff]  }
  0x59   :  { %953 = vmatprep.subr.bf16.mxu0 %v1969_v33  ;;  %905 = vmatpush1.bf16.msra.mxu1 %v2085_v7  ;;  %v1844_v33 = vcombine.high %v1075_v29, %v1079_v30  ;;  %v2094_v7 = vld [vmem:[#allocation2 + $0x3a4] ss:$8 sps:$4 sm:$0xff]  }
  0x5a   :  { %906 = vmatprep.subr.bf16.mxu1 %v2089_v8  ;;  %v2092_v8 = vld [vmem:[#allocation2 + $0x3a0] ss:$8 sps:$4 sm:$0xff]  }
  0x5b   :  { %v1103_v29 = vld [vmem:[#allocation4 + $0xe0] sm:$0xff] }
  0x5c   :  { %954 = vmatpush1.bf16.msra.mxu0 %v1971_v36  ;;  %v1707_v36 = vcombine.low %v56_v12, %v60_v13  ;;  %v2104_v12 = vld [vmem:[#allocation2 + $0x3c0] ss:$8 sps:$4 sm:$0xff]   ;;  %v2112_v13 = vld [vmem:[#allocation2 + $0x3d4] ss:$8 sps:$4 sm:$0xff]  }
  0x5d   :  { %955 = vmatprep.subr.bf16.mxu0 %v1972_v38  ;;  %907 = vmatpush1.bf16.msra.mxu1 %v2091_v11  ;;  %v2011_v38 = vld [vmem:[#allocation2 + $0x2b0] ss:$8 sps:$4 sm:$0xff]   ;;  %v2106_v11 = vld [vmem:[#allocation2 + $0x3c4] ss:$8 sps:$4 sm:$0xff]  }
  0x5e   :  { %908 = vmatprep.subr.bf16.mxu1 %v2095_v14  ;;  %v2110_v14 = vld [vmem:[#allocation2 + $0x3d0] ss:$8 sps:$4 sm:$0xff]  }
  0x60   :  { %956 = vmatpush1.bf16.msra.mxu0 %v1974_v41  ;;  %v2019_v41 = vld [vmem:[#allocation2 + $0x2d4] ss:$8 sps:$4 sm:$0xff]  }
  0x61   :  { %957 = vmatprep.subr.bf16.mxu0 %v1975_v42  ;;  %909 = vmatpush1.bf16.msra.mxu1 %v2097_v18  ;;  %v2017_v42 = vld [vmem:[#allocation2 + $0x2d0] ss:$8 sps:$4 sm:$0xff]  }
  0x62   :  { %910 = vmatprep.subr.bf16.mxu1 %v2101_v19  ;;  %v2119_v18 = vld [vmem:[#allocation2 + $0x3f0] ss:$8 sps:$4 sm:$0xff]  }
  0x64   :  { %958 = vmatpush1.bf16.msra.mxu0 %v1977_v44  ;;  %v2020_v44 = vld [vmem:[#allocation2 + $0x2e0] ss:$8 sps:$4 sm:$0xff]  }
  0x65   :  { %970 = vmatprep.subr.bf16.mxu0 %v1980_v46  ;;  %911 = vmatpush1.bf16.msra.mxu1 %v2103_v22  ;;  %v2026_v46 = vld [vmem:[#allocation2 + $0x2f0] ss:$8 sps:$4 sm:$0xff]  }
  0x66   :  { %912 = vmatprep.subr.bf16.mxu1 %v2107_v23 }
  0x67   :  { %960 = vmatmul.mubr.bf16.vlgmr.msra.gmra.mrb[0].mxu0 %v1709_v50  ;;  %v2290_v50 = vld [vmem:[%s2417_s0 + $0x18] sm:$0xff] }
  0x68   :  { %971 = vmatpush1.bf16.msra.mxu0 %v1978_v52  ;;  %1002 = vmatprep.mubr.bf16.mxu0 %v1712_v53  ;;  %v1711_v52 = vcombine.low %v2270_v47, %v2275_v48  ;;  %v2032_v53 = vld [vmem:[#allocation2 + $0x300] ss:$8 sps:$4 sm:$0xff]   ;;  %v2058_v47 = vld [vmem:[#allocation2 + $0x344] ss:$8 sps:$4 sm:$0xff]   ;;  %v1713_v19 = vcombine.low %v2290_v50, %v2295_v51 }
  0x69   :  { %972 = vmatprep.subr.bf16.mxu0 %v1983_v54  ;;  %913 = vmatpush1.bf16.msra.mxu1 %v2109_v26  ;;  %v1714_v54 = vcombine.high %v2290_v50, %v2295_v51  ;;  %v2056_v48 = vld [vmem:[#allocation2 + $0x340] ss:$8 sps:$4 sm:$0xff]  }
  0x6a   :  { %914 = vmatprep.subr.bf16.mxu1 %v2113_v27 }
  0x6c   :  { %973 = vmatpush1.bf16.msra.mxu0 %v1981_v57  ;;  %v2046_v57 = vld [vmem:[#allocation2 + $0x324] ss:$8 sps:$4 sm:$0xff]  }
  0x6d   :  { %974 = vmatprep.subr.bf16.mxu0 %v1986_v58  ;;  %915 = vmatpush1.bf16.msra.mxu1 %v2115_v32  ;;  %v2044_v58 = vld [vmem:[#allocation2 + $0x320] ss:$8 sps:$4 sm:$0xff]  }
  0x6e   :  { %1501 = vmatprep.subr.bf16.mxu1 %v1844_v33  ;;  %v1107_v32 = vld [vmem:[#allocation4 + $0x100] sm:$0xff] }
  0x6f   :  { %v1111_v33 = vld [vmem:[#allocation4 + $0x120] sm:$0xff] }
  0x70   :  { %975 = vmatpush1.bf16.msra.mxu0 %v1984_v61  ;;  %917 = vmatmul.mubr.bf16.vlgmr.msra.gmra.mrb[0].mxu1 %v1707_v36  ;;  %v2064_v61 = vld [vmem:[#allocation2 + $0x354] ss:$8 sps:$4 sm:$0xff]   ;;  %v1115_v36 = vld [vmem:[#allocation4 + $0x140] sm:$0xff] }
  0x71   :  { %976 = vmatprep.subr.bf16.mxu0 %v1989_v62  ;;  %1502 = vmatpush1.bf16.msra.mxu1 %v1843_v37  ;;  %v2062_v62 = vld [vmem:[#allocation2 + $0x350] ss:$8 sps:$4 sm:$0xff]   ;;  %v1119_v37 = vld [vmem:[#allocation4 + $0x160] sm:$0xff] }
  0x74   :  { %977 = vmatpush1.bf16.msra.mxu0 %v1987_v1  ;;  %v2076_v1 = vld [vmem:[#allocation2 + $0x374] ss:$8 sps:$4 sm:$0xff]  }
  0x75   :  { %978 = vmatprep.subr.bf16.mxu0 %v1992_v2  ;;  %v2074_v2 = vld [vmem:[#allocation2 + $0x370] ss:$8 sps:$4 sm:$0xff]  }
  0x78   :  { %979 = vmatpush1.bf16.msra.mxu0 %v1990_v5  ;;  %v2088_v5 = vld [vmem:[#allocation2 + $0x394] ss:$8 sps:$4 sm:$0xff]  }
  0x79   :  { %980 = vmatprep.subr.bf16.mxu0 %v1995_v6  ;;  %v2086_v6 = vld [vmem:[#allocation2 + $0x390] ss:$8 sps:$4 sm:$0xff]  }
  0x7c   :  { %981 = vmatpush1.bf16.msra.mxu0 %v1993_v9  ;;  %v2100_v9 = vld [vmem:[#allocation2 + $0x3b4] ss:$8 sps:$4 sm:$0xff]  }
  0x7d   :  { %982 = vmatprep.subr.bf16.mxu0 %v1998_v10  ;;  %v2098_v10 = vld [vmem:[#allocation2 + $0x3b0] ss:$8 sps:$4 sm:$0xff]  }
  0x80   :  { %983 = vmatpush1.bf16.msra.mxu0 %v1996_v16  ;;  %v2116_v16 = vld [vmem:[#allocation2 + $0x3e0] ss:$8 sps:$4 sm:$0xff]  }
  0x81   :  { %984 = vmatprep.subr.bf16.mxu0 %v2001_v17  ;;  %v2121_v17 = vld [vmem:[#allocation2 + $0x3f4] ss:$8 sps:$4 sm:$0xff]  }
  0x84   :  { %985 = vmatpush1.bf16.msra.mxu0 %v1999_v20  ;;  %v1083_v20 = vld [vmem:[#allocation4 + $0x40] sm:$0xff] }
  0x85   :  { %986 = vmatprep.subr.bf16.mxu0 %v2004_v21  ;;  %v1087_v21 = vld [vmem:[#allocation4 + $0x60] sm:$0xff] }
  0x86   :  { %v1851_v22 = vcombine.low %v1083_v20, %v1087_v21  ;;  %v1852_v23 = vcombine.high %v1083_v20, %v1087_v21 }
  0x88   :  { %987 = vmatpush1.bf16.msra.mxu0 %v2002_v24  ;;  %1503 = vmatprep.subr.bf16.mxu1 %v1852_v23  ;;  %v1091_v24 = vld [vmem:[#allocation4 + $0x80] sm:$0xff]  ;;  %v1084_v23 = vld [vmem:[#allocation4 + $0x48] sm:$0xff] }
  0x89   :  { %988 = vmatprep.subr.bf16.mxu0 %v2007_v25  ;;  %1504 = vmatpush1.bf16.msra.mxu1 %v1851_v22  ;;  %v1095_v25 = vld [vmem:[#allocation4 + $0xa0] sm:$0xff] }
  0x8a   :  { %v1860_v26 = vcombine.high %v1091_v24, %v1095_v25  ;;  %v1859_v27 = vcombine.low %v1091_v24, %v1095_v25  ;;  %v1088_v24 = vld [vmem:[#allocation4 + $0x68] sm:$0xff] }
  0x8c   :  { %989 = vmatpush1.bf16.msra.mxu0 %v2005_v28  ;;  %1505 = vmatprep.subr.bf16.mxu1 %v1860_v26  ;;  %v1099_v28 = vld [vmem:[#allocation4 + $0xc0] sm:$0xff] }
  0x8d   :  { %990 = vmatprep.subr.bf16.mxu0 %v2010_v31  ;;  %1506 = vmatpush1.bf16.msra.mxu1 %v1859_v27  ;;  %v1868_v30 = vcombine.high %v1099_v28, %v1103_v29  ;;  %v1867_v31 = vcombine.low %v1099_v28, %v1103_v29  ;;  %v1854_v27 = vcombine.high %v1084_v23, %v1088_v24  ;;  %v1092_v28 = vld [vmem:[#allocation4 + $0x88] sm:$0xff] }
  0x8e   :  { %v1096_v29 = vld [vmem:[#allocation4 + $0xa8] sm:$0xff] }
  0x8f   :  { %1507 = vmatprep.subr.bf16.mxu1 %v1868_v30  ;;  %v1853_v30 = vcombine.low %v1084_v23, %v1088_v24  ;;  %v1078_v24 = vld [vmem:[#allocation4 + $0x18] sm:$0xff] }
  0x90   :  { %991 = vmatpush1.bf16.msra.mxu0 %v2008_v34  ;;  %v1876_v34 = vcombine.high %v1107_v32, %v1111_v33 }
  0x91   :  { %992 = vmatprep.subr.bf16.mxu0 %v2013_v35  ;;  %1508 = vmatpush1.bf16.msra.mxu1 %v1867_v31  ;;  %v1875_v35 = vcombine.low %v1107_v32, %v1111_v33  ;;  %v1862_v31 = vcombine.high %v1092_v28, %v1096_v29  ;;  %v1100_v32 = vld [vmem:[#allocation4 + $0xc8] sm:$0xff] }
  0x92   :  { %1509 = vmatprep.subr.bf16.mxu1 %v1876_v34  ;;  %v1104_v33 = vld [vmem:[#allocation4 + $0xe8] sm:$0xff]  ;;  %v1861_v34 = vcombine.low %v1092_v28, %v1096_v29  ;;  %v1086_v29 = vld [vmem:[#allocation4 + $0x58] sm:$0xff] }
  0x94   :  { %993 = vmatpush1.bf16.msra.mxu0 %v2011_v38  ;;  %v1123_v38 = vld [vmem:[#allocation4 + $0x180] sm:$0xff] }
  0x95   :  { %994 = vmatprep.subr.bf16.mxu0 %v2016_v39  ;;  %1510 = vmatpush1.bf16.msra.mxu1 %v1875_v35  ;;  %v1883_v39 = vcombine.low %v1115_v36, %v1119_v37  ;;  %v1870_v35 = vcombine.high %v1100_v32, %v1104_v33 }
  0x98   :  { %995 = vmatpush1.bf16.msra.mxu0 %v2014_v40  ;;  %v1884_v40 = vcombine.high %v1115_v36, %v1119_v37  ;;  %v1108_v36 = vld [vmem:[#allocation4 + $0x108] sm:$0xff] }
  0x99   :  { %996 = vmatprep.subr.bf16.mxu0 %v2019_v41  ;;  %v1127_v41 = vld [vmem:[#allocation4 + $0x1a0] sm:$0xff]  ;;  %v1112_v37 = vld [vmem:[#allocation4 + $0x128] sm:$0xff] }
  0x9a   :  { %1511 = vmatprep.subr.bf16.mxu1 %v1884_v40  ;;  %v1891_v51 = vcombine.low %v1123_v38, %v1127_v41  ;;  %v1116_v40 = vld [vmem:[#allocation4 + $0x148] sm:$0xff] }
  0x9b   :  { %1512 = vmatpush1.bf16.msra.mxu1 %v1883_v39  ;;  %v1878_v39 = vcombine.high %v1108_v36, %v1112_v37 }
  0x9c   :  { %997 = vmatpush1.bf16.msra.mxu0 %v2017_v42  ;;  %v2180_v42 = vmov 0  }
  0x9d   :  { %998 = vmatprep.subr.bf16.mxu0 %v2022_v43  ;;  %1533 = vmatprep.mubr.bf16.mxu1 %v2180_v42  ;;  %v1892_v43 = vcombine.high %v1123_v38, %v1127_v41  ;;  %v1869_v38 = vcombine.low %v1100_v32, %v1104_v33  ;;  %v1120_v41 = vld [vmem:[#allocation4 + $0x168] sm:$0xff]  ;;  %v1094_v33 = vld [vmem:[#allocation4 + $0x98] sm:$0xff] }
  0x9f   :  { %1513 = vmatprep.subr.bf16.mxu1 %v1892_v43  ;;  %v1877_v43 = vcombine.low %v1108_v36, %v1112_v37  ;;  %v1102_v37 = vld [vmem:[#allocation4 + $0xd8] sm:$0xff] }
  0xa0   :  { %999 = vmatpush1.bf16.msra.mxu0 %v2020_v44  ;;  %v2304_v44 = vld [vmem:[#allocation4 + $0x8] sm:$0xff]  ;;  %1514 = vmatpush1.bf16.msra.mxu1 %v1891_v51 }
  0xa1   :  { %1000 = vmatprep.subr.bf16.mxu0 %v2028_v45  ;;  %v2306_v45 = vld [vmem:[#allocation4 + $0x28] sm:$0xff] }
  0xa2   :  { %v1845_v50 = vcombine.low %v2304_v44, %v2306_v45  ;;  %v1132_v51 = vld [vmem:[#allocation4 + $0x1c8] sm:$0xff] }
  0xa4   :  { %1001 = vmatpush1.bf16.msra.mxu0 %v2026_v46  ;;  %v1131_v46 = vld [vmem:[#allocation4 + $0x1c0] sm:$0xff] }
  0xa5   :  { %1013 = vmatprep.subr.bf16.mxu0 %v2034_v49  ;;  %v1135_v49 = vld [vmem:[#allocation4 + $0x1e0] sm:$0xff] }
  0xa7   :  { %1003 = vmatmul.mubr.bf16.vlgmr.msra.gmra.mrb[0].mxu0 %v1711_v52  ;;  %v1900_v52 = vcombine.high %v1131_v46, %v1135_v49 }
  0xa8   :  { %1014 = vmatpush1.bf16.msra.mxu0 %v2032_v53  ;;  %1045 = vmatprep.mubr.bf16.mxu0 %v1714_v54  ;;  %v1899_v53 = vcombine.low %v1131_v46, %v1135_v49  ;;  %v1846_v54 = vcombine.high %v2304_v44, %v2306_v45  ;;  %v1886_v44 = vcombine.high %v1116_v40, %v1120_v41  ;;  %v1124_v45 = vld [vmem:[#allocation4 + $0x188] sm:$0xff] }
  0xa9   :  { %1015 = vmatprep.subr.bf16.mxu0 %v2040_v55  ;;  %1515 = vmatprep.subr.bf16.mxu1 %v1900_v52  ;;  %v1128_v46 = vld [vmem:[#allocation4 + $0x1a8] sm:$0xff]  ;;  %v1885_v49 = vcombine.low %v1116_v40, %v1120_v41  ;;  %v1110_v41 = vld [vmem:[#allocation4 + $0x118] sm:$0xff] }
  0xaa   :  { %1516 = vmatpush1.bf16.msra.mxu1 %v1899_v53  ;;  %v1136_v52 = vld [vmem:[#allocation4 + $0x1e8] sm:$0xff]  ;;  %v1893_v53 = vcombine.low %v1124_v45, %v1128_v46 }
  0xab   :  { %1544 = vmatprep.subr.bf16.mxu1 %v1846_v54  ;;  %v1902_v54 = vcombine.high %v1132_v51, %v1136_v52 }
  0xac   :  { %1016 = vmatpush1.bf16.msra.mxu0 %v2038_v56 }
  0xad   :  { %1017 = vmatprep.subr.bf16.mxu0 %v2046_v57 }
  0xb0   :  { %1018 = vmatpush1.bf16.msra.mxu0 %v2044_v58 }
  0xb1   :  { %1019 = vmatprep.subr.bf16.mxu0 %v2052_v59  ;;  %v194_v59 = vlaneseq }
  0xb4   :  { %1020 = vmatpush1.bf16.msra.mxu0 %v2050_v60  ;;  %v2312_v60 = vshrl.u32 %v194_v59, 7  ;;  %v1085_v59 = vld [vmem:[#allocation4 + $0x50] sm:$0xff] }
  0xb5   :  { %1021 = vmatprep.subr.bf16.mxu0 %v2058_v47 }
  0xb6   :  { %v196_v47 = vsub.s32 0, %v2312_v60 }
  0xb8   :  { %1022 = vmatpush1.bf16.msra.mxu0 %v2056_v48  ;;  %v192_v48 = vld [vmem:[%s2419_s2] sm:$0x3] }
  0xb9   :  { %1023 = vmatprep.subr.bf16.mxu0 %v2064_v61  ;;  %v200_v61 = vsub.s32 1, %v2312_v60 }
  0xbc   :  { %1024 = vmatpush1.bf16.msra.mxu0 %v2062_v62  ;;  %v197_v62 = vrot.slane %v192_v48, %v196_v47 }
  0xbd   :  { %1025 = vmatprep.subr.bf16.mxu0 %v2070_v63  ;;  %v201_v63 = vrot.slane %v192_v48, %v200_v61  ;;  %v1089_v48 = vld [vmem:[#allocation4 + $0x70] sm:$0xff] }
  0xc0   :  { %1026 = vmatpush1.bf16.msra.mxu0 %v2068_v0 }
  0xc1   :  { %1027 = vmatprep.subr.bf16.mxu0 %v2076_v1 }
  0xc4   :  { %1028 = vmatpush1.bf16.msra.mxu0 %v2074_v2 }
  0xc5   :  { %1029 = vmatprep.subr.bf16.mxu0 %v2082_v3 }
  0xc8   :  { %1030 = vmatpush1.bf16.msra.mxu0 %v2080_v4 }
  0xc9   :  { %1031 = vmatprep.subr.bf16.mxu0 %v2088_v5 }
  0xcc   :  { %1032 = vmatpush1.bf16.msra.mxu0 %v2086_v6 }
  0xcd   :  { %1033 = vmatprep.subr.bf16.mxu0 %v2094_v7 }
  0xd0   :  { %1034 = vmatpush1.bf16.msra.mxu0 %v2092_v8 }
  0xd1   :  { %1035 = vmatprep.subr.bf16.mxu0 %v2100_v9 }
  0xd4   :  { %1036 = vmatpush1.bf16.msra.mxu0 %v2098_v10 }
  0xd5   :  { %1037 = vmatprep.subr.bf16.mxu0 %v2106_v11 }
  0xd8   :  { %1038 = vmatpush1.bf16.msra.mxu0 %v2104_v12 }
  0xd9   :  { %1039 = vmatprep.subr.bf16.mxu0 %v2112_v13 }
  0xdc   :  { %1040 = vmatpush1.bf16.msra.mxu0 %v2110_v14 }
  0xdd   :  { %1041 = vmatprep.subr.bf16.mxu0 %v2118_v15 }
  0xe0   :  { %1042 = vmatpush1.bf16.msra.mxu0 %v2116_v16  ;;  %v1056_v16 = vld [vmem:[%s2420_s3] sm:$0xff] }
  0xe1   :  { %1043 = vmatprep.subr.bf16.mxu0 %v2121_v17 }
  0xe4   :  { %1044 = vmatpush1.bf16.msra.mxu0 %v2119_v18  ;;  %v1057_v18 = vld [vmem:[%s2420_s3 + $0x8] sm:$0xff] }
  0xe7   :  { %1046 = vmatmul.mubr.bf16.vlgmr.msra.gmra.mrb[0].mxu0 %v1713_v19 }
 0x143   :  { %v918_v55 = vpop.f32.mrb[0].mxu1 }
 0x144   :  { %v920_v56 = vpop.f32.mrb[1].mxu1  ;;  %v919_v0 = vadd.f32 %v918_v55, %v197_v62  ;;  %v1077_v55 = vld [vmem:[#allocation4 + $0x10] sm:$0xff] }
 0x145   :  { %v922_v57 = vpop.f32.mrb[2].mxu1  ;;  %v921_v1 = vadd.f32 %v920_v56, %v201_v63  ;;  %v1081_v56 = vld [vmem:[#allocation4 + $0x30] sm:$0xff] }
 0x146   :  { %v924_v58 = vpop.f32.mrb[3].mxu1  ;;  %v923_v3 = vadd.f32 %v922_v57, %v197_v62  ;;  %v1901_v57 = vcombine.low %v1132_v51, %v1136_v52  ;;  %v1847_v62 = vcombine.low %v1077_v55, %v1081_v56  ;;  %v1126_v51 = vld [vmem:[#allocation4 + $0x198] sm:$0xff] }
 0x147   :  { %v925_v6 = vadd.f32 %v924_v58, %v201_v63  ;;  %v1848_v58 = vcombine.high %v1077_v55, %v1081_v56  ;;  %v1856_v63 = vcombine.high %v1085_v59, %v1089_v48  ;;  %v1130_v52 = vld [vmem:[#allocation4 + $0x1b8] sm:$0xff] }
 0x148   :  { %v1134_v55 = vld [vmem:[#allocation4 + $0x1d8] sm:$0xff] }
 0x149   :  { %v1138_v56 = vld [vmem:[#allocation4 + $0x1f8] sm:$0xff] }
 0x1ba   :  { %v1047_v2 = vpop.f32.mrb[0].mxu0 }
 0x1bb   :  { %v1908_v4 = vadd.f32 %v1047_v2, %v919_v0  ;;  %v1049_v5 = vpop.f32.mrb[1].mxu0  ;;  %v1093_v0 = vld [vmem:[#allocation4 + $0x90] sm:$0xff]  ;;  %v1855_v2 = vcombine.low %v1085_v59, %v1089_v48  ;;  %v1905_v59 = vcombine.low %v1134_v55, %v1138_v56  ;;  %v1139_v48 = vld [vmem:[%s2422_s5] sm:$0xff] }
 0x1bc   :  { %v1910_v7 = vadd.f32 %v1049_v5, %v921_v1  ;;  %v1051_v8 = vpop.f32.mrb[2].mxu0  ;;  %v1097_v1 = vld [vmem:[#allocation4 + $0xb0] sm:$0xff] }
 0x1bd   :  { %1068 = vst [vmem:[%s2423_s6] sm:$0xff] %v1908_v4  ;;  %v1912_v9 = vadd.f32 %v1051_v8, %v923_v3  ;;  %v1053_v10 = vpop.f32.mrb[3].mxu0  ;;  %v1864_v3 = vcombine.high %v1093_v0, %v1097_v1  ;;  %v1105_v5 = vld [vmem:[#allocation4 + $0xf0] sm:$0xff] }
 0x1be   :  { %v1058_v11 = vmul.f32 0.5, %v1910_v7  ;;  %1070 = vst [vmem:[%s2424_s7] sm:$0xff] %v1910_v7  ;;  %v1914_v12 = vadd.f32 %v1053_v10, %v925_v6  ;;  %v1863_v6 = vcombine.low %v1093_v0, %v1097_v1  ;;  %v1109_v8 = vld [vmem:[#allocation4 + $0x110] sm:$0xff] }
 0x1bf   :  { %1069 = vst [vmem:[%s2423_s6 + $0x8] sm:$0xff] %v1912_v9 }
 0x1c0   :  { %v1060_v13 = vmul.f32 1.442695, %v1058_v11  ;;  %v1059_v14 = vmul.f32 0.5, %v1914_v12  ;;  %1071 = vst [vmem:[%s2424_s7 + $0x8] sm:$0xff] %v1914_v12  ;;  %v1117_v12 = vld [vmem:[#allocation4 + $0x150] sm:$0xff] }
 0x1c2   :  { %2122 = vpow2.f32 %v1060_v13  ;;  %v1062_v15 = vmul.f32 1.442695, %v1059_v14  ;;  %v1121_v13 = vld [vmem:[#allocation4 + $0x170] sm:$0xff] }
 0x1c4   :  { %2124 = vpow2.f32 %v1062_v15  ;;  %v1888_v15 = vcombine.high %v1117_v12, %v1121_v13 }
 0x1cc   :  { %v2123_v17 = vpop.eup %2122 }
 0x1cd   :  { %v1064_v19 = vmul.f32 %v2123_v17, %v1056_v16  ;;  %v1125_v16 = vld [vmem:[#allocation4 + $0x190] sm:$0xff] }
 0x1ce   :  { %v2125_v20 = vpop.eup %2124  ;;  %v1129_v17 = vld [vmem:[#allocation4 + $0x1b0] sm:$0xff] }
 0x1cf   :  { %v1065_v21 = vmul.f32 %v2125_v20, %v1057_v18  ;;  %v1066_v22 = vadd.f32 %v1908_v4, %v1064_v19  ;;  %v1101_v4 = vld [vmem:[#allocation4 + $0xd0] sm:$0xff]  ;;  %v1887_v18 = vcombine.low %v1117_v12, %v1121_v13  ;;  %v1896_v19 = vcombine.high %v1125_v16, %v1129_v17 }
 0x1d0   :  { %v1872_v7 = vcombine.high %v1101_v4, %v1105_v5  ;;  %v1871_v10 = vcombine.low %v1101_v4, %v1105_v5  ;;  %v1133_v20 = vld [vmem:[#allocation4 + $0x1d0] sm:$0xff] }
 0x1d1   :  { %v1067_v25 = vadd.f32 %v1912_v9, %v1065_v21  ;;  %1072 = vst [vmem:[%s2425_s8] sm:$0xff] %v1066_v22  ;;  %v1113_v9 = vld [vmem:[#allocation4 + $0x130] sm:$0xff] }
 0x1d2   :  { %v1880_v11 = vcombine.high %v1109_v8, %v1113_v9  ;;  %v1879_v14 = vcombine.low %v1109_v8, %v1113_v9  ;;  %v1137_v21 = vld [vmem:[#allocation4 + $0x1f0] sm:$0xff] }
 0x1d3   :  { %1073 = vst [vmem:[%s2425_s8 + $0x8] sm:$0xff] %v1067_v25  ;;  %v2347_v26 = vpack.c.bf16 %v1067_v25, %v1066_v22  ;;  %v1895_v22 = vcombine.low %v1125_v16, %v1129_v17  ;;  %v1904_v23 = vcombine.high %v1133_v20, %v1137_v21  ;;  %v1082_v25 = vld [vmem:[#allocation4 + $0x38] sm:$0xff]  ;;  %v1159_v17 = vsub.s32 4, %v2312_v60 }
 0x1d4   :  { %v1850_v28 = vcombine.high %v1078_v24, %v1082_v25 }
 0x1d5   :  { %1534 = vmatmul.mubr.bf16.vlgmr.msra.gmra.mrb[4].mxu1 %v2347_v26 }
 0x1d6   :  { %1545 = vmatpush1.bf16.msra.mxu1 %v1845_v50  ;;  %1576 = vmatprep.mubr.bf16.mxu1 %v2180_v42  ;;  %v1894_v50 = vcombine.high %v1124_v45, %v1128_v46  ;;  %v1118_v46 = vld [vmem:[#allocation4 + $0x158] sm:$0xff] }
 0x1d7   :  { %1546 = vmatprep.subr.bf16.mxu1 %v1854_v27  ;;  %v1903_v27 = vcombine.low %v1133_v20, %v1137_v21 }
 0x1da   :  { %1547 = vmatpush1.bf16.msra.mxu1 %v1853_v30  ;;  %v1090_v30 = vld [vmem:[#allocation4 + $0x78] sm:$0xff] }
 0x1db   :  { %1548 = vmatprep.subr.bf16.mxu1 %v1862_v31  ;;  %v1849_v31 = vcombine.low %v1078_v24, %v1082_v25  ;;  %v1858_v32 = vcombine.high %v1086_v29, %v1090_v30 }
 0x1de   :  { %1549 = vmatpush1.bf16.msra.mxu1 %v1861_v34  ;;  %v1098_v34 = vld [vmem:[#allocation4 + $0xb8] sm:$0xff] }
 0x1df   :  { %1550 = vmatprep.subr.bf16.mxu1 %v1870_v35  ;;  %v1857_v35 = vcombine.low %v1086_v29, %v1090_v30  ;;  %v1866_v36 = vcombine.high %v1094_v33, %v1098_v34  ;;  %v1167_v30 = vsub.s32 6, %v2312_v60 }
 0x1e2   :  { %1551 = vmatpush1.bf16.msra.mxu1 %v1869_v38  ;;  %v1106_v38 = vld [vmem:[#allocation4 + $0xf8] sm:$0xff] }
 0x1e3   :  { %1552 = vmatprep.subr.bf16.mxu1 %v1878_v39  ;;  %v1865_v39 = vcombine.low %v1094_v33, %v1098_v34  ;;  %v1874_v40 = vcombine.high %v1102_v37, %v1106_v38 }
 0x1e6   :  { %1553 = vmatpush1.bf16.msra.mxu1 %v1877_v43  ;;  %v1114_v43 = vld [vmem:[#allocation4 + $0x138] sm:$0xff] }
 0x1e7   :  { %1554 = vmatprep.subr.bf16.mxu1 %v1886_v44  ;;  %v1873_v44 = vcombine.low %v1102_v37, %v1106_v38  ;;  %v1882_v45 = vcombine.high %v1110_v41, %v1114_v43 }
 0x1ea   :  { %1555 = vmatpush1.bf16.msra.mxu1 %v1885_v49  ;;  %v1122_v49 = vld [vmem:[#allocation4 + $0x178] sm:$0xff] }
 0x1eb   :  { %1556 = vmatprep.subr.bf16.mxu1 %v1894_v50  ;;  %v1881_v50 = vcombine.low %v1110_v41, %v1114_v43 }
 0x1ee   :  { %1557 = vmatpush1.bf16.msra.mxu1 %v1893_v53  ;;  %v1889_v53 = vcombine.low %v1118_v46, %v1122_v49 }
 0x1ef   :  { %1558 = vmatprep.subr.bf16.mxu1 %v1902_v54  ;;  %v1898_v54 = vcombine.high %v1126_v51, %v1130_v52 }
 0x1f2   :  { %1559 = vmatpush1.bf16.msra.mxu1 %v1901_v57  ;;  %v1897_v57 = vcombine.low %v1126_v51, %v1130_v52 }
 0x1f3   :  { %1587 = vmatprep.subr.bf16.mxu1 %v1848_v58  ;;  %v1906_v58 = vcombine.high %v1134_v55, %v1138_v56 }
 0x1f5   :  { %1577 = vmatmul.mubr.bf16.vlgmr.msra.gmra.mrb[8].mxu1 %v2347_v26 }
 0x1f6   :  { %1588 = vmatpush1.bf16.msra.mxu1 %v1847_v62  ;;  %1619 = vmatprep.mubr.bf16.mxu1 %v2180_v42  ;;  %v1144_v62 = vrot.slane %v1139_v48, %v196_v47  ;;  %v1151_v47 = vsub.s32 2, %v2312_v60 }
 0x1f7   :  { %1589 = vmatprep.subr.bf16.mxu1 %v1856_v63  ;;  %v1148_v63 = vrot.slane %v1139_v48, %v200_v61  ;;  %v1155_v61 = vsub.s32 3, %v2312_v60 }
 0x1f9   :  { %v1156_v8 = vrot.slane %v1139_v48, %v1155_v61 }
 0x1fa   :  { %1590 = vmatpush1.bf16.msra.mxu1 %v1855_v2 }
 0x1fb   :  { %1591 = vmatprep.subr.bf16.mxu1 %v1864_v3 }
 0x1fe   :  { %1592 = vmatpush1.bf16.msra.mxu1 %v1863_v6 }
 0x1ff   :  { %1593 = vmatprep.subr.bf16.mxu1 %v1872_v7  ;;  %v1152_v7 = vrot.slane %v1139_v48, %v1151_v47 }
 0x202   :  { %1594 = vmatpush1.bf16.msra.mxu1 %v1871_v10 }
 0x203   :  { %1595 = vmatprep.subr.bf16.mxu1 %v1880_v11 }
 0x206   :  { %1596 = vmatpush1.bf16.msra.mxu1 %v1879_v14 }
 0x207   :  { %1597 = vmatprep.subr.bf16.mxu1 %v1888_v15 }
 0x20a   :  { %1598 = vmatpush1.bf16.msra.mxu1 %v1887_v18  ;;  %v1163_v18 = vsub.s32 5, %v2312_v60 }
 0x20b   :  { %1599 = vmatprep.subr.bf16.mxu1 %v1896_v19  ;;  %v1160_v19 = vrot.slane %v1139_v48, %v1159_v17 }
 0x20c   :  { %v1164_v20 = vrot.slane %v1139_v48, %v1163_v18 }
 0x20e   :  { %1600 = vmatpush1.bf16.msra.mxu1 %v1895_v22 }
 0x20f   :  { %1601 = vmatprep.subr.bf16.mxu1 %v1904_v23 }
 0x212   :  { %1602 = vmatpush1.bf16.msra.mxu1 %v1903_v27 }
 0x213   :  { %1630 = vmatprep.subr.bf16.mxu1 %v1850_v28 }
 0x215   :  { %1620 = vmatmul.mubr.bf16.vlgmr.msra.gmra.mrb[12].mxu1 %v2347_v26 }
 0x216   :  { %1631 = vmatpush1.bf16.msra.mxu1 %v1849_v31  ;;  %1662 = vmatprep.mubr.bf16.mxu1 %v2180_v42  ;;  %v1890_v42 = vcombine.high %v1118_v46, %v1122_v49  ;;  %v1171_v31 = vsub.s32 7, %v2312_v60 }
 0x217   :  { %1632 = vmatprep.subr.bf16.mxu1 %v1858_v32  ;;  %v1168_v32 = vrot.slane %v1139_v48, %v1167_v30 }
 0x218   :  { %v1172_v33 = vrot.slane %v1139_v48, %v1171_v31 }
 0x21a   :  { %1633 = vmatpush1.bf16.msra.mxu1 %v1857_v35 }
 0x21b   :  { %1634 = vmatprep.subr.bf16.mxu1 %v1866_v36 }
 0x21e   :  { %1635 = vmatpush1.bf16.msra.mxu1 %v1865_v39 }
 0x21f   :  { %1636 = vmatprep.subr.bf16.mxu1 %v1874_v40 }
 0x222   :  { %1637 = vmatpush1.bf16.msra.mxu1 %v1873_v44 }
 0x223   :  { %1638 = vmatprep.subr.bf16.mxu1 %v1882_v45 }
 0x226   :  { %1639 = vmatpush1.bf16.msra.mxu1 %v1881_v50 }
 0x227   :  { %1640 = vmatprep.subr.bf16.mxu1 %v1890_v42 }
 0x22a   :  { %1641 = vmatpush1.bf16.msra.mxu1 %v1889_v53 }
 0x22b   :  { %1642 = vmatprep.subr.bf16.mxu1 %v1898_v54 }
 0x22e   :  { %1643 = vmatpush1.bf16.msra.mxu1 %v1897_v57 }
 0x22f   :  { %1644 = vmatprep.subr.bf16.mxu1 %v1906_v58 }
 0x232   :  { %1645 = vmatpush1.bf16.msra.mxu1 %v1905_v59 }
 0x235   :  { %1663 = vmatmul.mubr.bf16.vlgmr.msra.gmra.mrb[16].mxu1 %v2347_v26 }
 0x2a8   :  { %v1535_v0 = vpop.f32.mrb[4].mxu1 }
 0x2a9   :  { %v1536_v1 = vadd.f32 %v1535_v0, %v1144_v62  ;;  %v1537_v2 = vpop.f32.mrb[5].mxu1 }
 0x2aa   :  { %v1538_v3 = vadd.f32 %v1537_v2, %v1148_v63  ;;  %v1539_v4 = vpop.f32.mrb[6].mxu1 }
 0x2ab   :  { %1673 = vst [vmem:[%s2426_s9] sm:$0xff] %v1536_v1  ;;  %v1540_v26 = vadd.f32 %v1539_v4, %v1144_v62  ;;  %v1541_v5 = vpop.f32.mrb[7].mxu1 }
 0x2ac   :  { %1674 = vst [vmem:[%s2426_s9 + $0x8] sm:$0xff] %v1538_v3  ;;  %v1542_v6 = vadd.f32 %v1541_v5, %v1148_v63 }
 0x2ad   :  { %1681 = vst [vmem:[%s2426_s9 + $0x40] sm:$0xff] %v1540_v26 }
 0x2ae   :  { %1682 = vst [vmem:[%s2426_s9 + $0x48] sm:$0xff] %v1542_v6 }
 0x2c8   :  { %v1578_v9 = vpop.f32.mrb[8].mxu1 }
 0x2c9   :  { %v1579_v10 = vadd.f32 %v1578_v9, %v1152_v7  ;;  %v1580_v11 = vpop.f32.mrb[9].mxu1 }
 0x2ca   :  { %v1581_v12 = vadd.f32 %v1580_v11, %v1156_v8  ;;  %v1582_v13 = vpop.f32.mrb[10].mxu1 }
 0x2cb   :  { %1675 = vst [vmem:[%s2426_s9 + $0x10] sm:$0xff] %v1579_v10  ;;  %v1583_v14 = vadd.f32 %v1582_v13, %v1152_v7  ;;  %v1584_v15 = vpop.f32.mrb[11].mxu1 }
 0x2cc   :  { %1676 = vst [vmem:[%s2426_s9 + $0x18] sm:$0xff] %v1581_v12  ;;  %v1585_v16 = vadd.f32 %v1584_v15, %v1156_v8 }
 0x2cd   :  { %1683 = vst [vmem:[%s2426_s9 + $0x50] sm:$0xff] %v1583_v14 }
 0x2ce   :  { %1684 = vst [vmem:[%s2426_s9 + $0x58] sm:$0xff] %v1585_v16 }
 0x2e8   :  { %v1621_v21 = vpop.f32.mrb[12].mxu1 }
 0x2e9   :  { %v1622_v22 = vadd.f32 %v1621_v21, %v1160_v19  ;;  %v1623_v23 = vpop.f32.mrb[13].mxu1 }
 0x2ea   :  { %v1624_v24 = vadd.f32 %v1623_v23, %v1164_v20  ;;  %v1625_v25 = vpop.f32.mrb[14].mxu1 }
 0x2eb   :  { %1677 = vst [vmem:[%s2426_s9 + $0x20] sm:$0xff] %v1622_v22  ;;  %v1626_v27 = vadd.f32 %v1625_v25, %v1160_v19  ;;  %v1627_v28 = vpop.f32.mrb[15].mxu1 }
 0x2ec   :  { %1678 = vst [vmem:[%s2426_s9 + $0x28] sm:$0xff] %v1624_v24  ;;  %v1628_v29 = vadd.f32 %v1627_v28, %v1164_v20 }
 0x2ed   :  { %1685 = vst [vmem:[%s2426_s9 + $0x60] sm:$0xff] %v1626_v27 }
 0x2ee   :  { %1686 = vst [vmem:[%s2426_s9 + $0x68] sm:$0xff] %v1628_v29 }
 0x308   :  { %v1664_v34 = vpop.f32.mrb[16].mxu1 }
 0x309   :  { %v1665_v35 = vadd.f32 %v1664_v34, %v1168_v32  ;;  %v1666_v36 = vpop.f32.mrb[17].mxu1 }
 0x30a   :  { %v1667_v37 = vadd.f32 %v1666_v36, %v1172_v33  ;;  %v1668_v38 = vpop.f32.mrb[18].mxu1 }
 0x30b   :  { %1679 = vst [vmem:[%s2426_s9 + $0x30] sm:$0xff] %v1665_v35  ;;  %v1669_v39 = vadd.f32 %v1668_v38, %v1168_v32  ;;  %v1670_v40 = vpop.f32.mrb[19].mxu1 }
 0x30c   :  { %1680 = vst [vmem:[%s2426_s9 + $0x38] sm:$0xff] %v1667_v37  ;;  %v1671_v41 = vadd.f32 %v1670_v40, %v1172_v33 }
 0x30d   :  { %1687 = vst [vmem:[%s2426_s9 + $0x70] sm:$0xff] %v1669_v39 }
 0x30e   :  { %1688 = vst [vmem:[%s2426_s9 + $0x78] sm:$0xff] %v1671_v41 }
 0x30f   :  { %1705 = vsyncpa [#allocation3], 1 }
 0x310   :  { %1706 = vsyncpa [#allocation5], 1 }

</bundles_post_ra>
